<compile_context>
chip_gen: v6e
topology: v6e:2x2x1
jax: 0.10.0
libtpu: 0.0.40
codegen_flags: <defaults>
</compile_context>

<pallas_src>
import jax
import jax.numpy as jnp
from jax.experimental import pallas as pl
from jax.experimental.pallas import tpu as pltpu

_K = 1024     # flattened feature size required by nn.Linear(1024, numClass)
_LANE = 128   # TPU lane width (numClass padded up to a multiple of this)


def _round_up(x, m):
    return (x + m - 1) // m * m


def _linear_kernel(x_ref, w_ref, b_ref, o_ref):
    # x_ref: [TB, 1024] native dtype   w_ref: [1024, Npad] bf16
    # b_ref: [1,  Npad] f32            o_ref: [TB,  Npad]  out dtype
    x = x_ref[...].astype(jnp.bfloat16)      # VPU cast, hidden under DMA/MXU
    acc = jnp.dot(x, w_ref[...], preferred_element_type=jnp.float32)
    o_ref[...] = (acc + b_ref[...]).astype(o_ref.dtype)


def prepare_sqnet_fc_params(weight, bias):
    """One-time parameter prep (NOT per forward call).

    weight : [numClass, 1024]  (PyTorch nn.Linear layout)
    bias   : [numClass]
    returns (w_t_pad [1024, Npad] bf16, b_pad [1, Npad] f32, numClass)
    """
    n_class = weight.shape[0]
    assert weight.shape[1] == _K, "sqNetFC expects a 1024-feature Linear"
    n_pad = _round_up(max(n_class, _LANE), _LANE)
    w_t_pad = (
        jnp.zeros((_K, n_pad), jnp.bfloat16)
        .at[:, :n_class]
        .set(weight.T.astype(jnp.bfloat16))
    )
    b_pad = (
        jnp.zeros((1, n_pad), jnp.float32)
        .at[0, :n_class]
        .set(bias.astype(jnp.float32))
    )
    return w_t_pad, b_pad, n_class


def _choose_batch_tile(B):
    """Batch tile: whole batch if small, else multiple of 256 with >=2 grid steps."""
    if B <= 256:
        return B                                  # block == full batch dim (layout-legal)
    n_tiles = max(2, pl.cdiv(B, 1024))            # >=2 steps so v7x megacore splits work
    return min(1024, _round_up(pl.cdiv(B, n_tiles), 256))


def sqnet_fc_forward(x_nchw, w_t_pad, b_pad, n_class, out_dtype=jnp.float32):
    """Forward pass of sqNetFC.

    x_nchw  : [B, C, H, W] with C*H*W == 1024 (any float dtype; NOT pre-cast)
    w_t_pad : [1024, Npad] bf16   (from prepare_sqnet_fc_params)
    b_pad   : [1, Npad]    f32
    returns : [B, n_class] out_dtype
    """
    B = x_nchw.shape[0]
    # nn.Flatten: pure row-major reshape on the original dtype (no relayout, no cast).
    x2d = x_nchw.reshape(B, -1)
    assert x2d.shape[1] == _K, "sqNetFC expects 1024 flattened features"

    n_pad = w_t_pad.shape[1]
    tb = _choose_batch_tile(B)
    grid = (pl.cdiv(B, tb),)

    out_itemsize = jnp.dtype(out_dtype).itemsize
    cost = pl.CostEstimate(
        flops=2 * B * _K * n_pad,
        transcendentals=0,
        bytes_accessed=(
            B * _K * x2d.dtype.itemsize
            + w_t_pad.size * 2
            + b_pad.size * 4
            + B * n_pad * out_itemsize
        ),
    )

    out = pl.pallas_call(
        _linear_kernel,
        out_shape=jax.ShapeDtypeStruct((B, n_pad), out_dtype),
        grid_spec=pltpu.PrefetchScalarGridSpec(
            num_scalar_prefetch=0,
            grid=grid,
            in_specs=[
                pl.BlockSpec((tb, _K), lambda i: (i, 0)),      # x tile streams
                pl.BlockSpec((_K, n_pad), lambda i: (0, 0)),   # weight VMEM-resident
                pl.BlockSpec((1, n_pad), lambda i: (0, 0)),    # bias VMEM-resident
            ],
            out_specs=pl.BlockSpec((tb, n_pad), lambda i: (i, 0)),
        ),
        compiler_params=pltpu.CompilerParams(
            dimension_semantics=("parallel",),
            vmem_limit_bytes=32 * 1024 * 1024,
        ),
        cost_estimate=cost,
    )(x2d, w_t_pad, b_pad)

    # TODO(synk): consumers that can read the 128-lane-padded logits directly
    # (e.g. a fused argmax/softmax) should skip this slice to save one output
    # re-read in HBM.
    return out[:, :n_class]


if __name__ == "__main__":
    key = jax.random.PRNGKey(0)
    k_x, k_w, k_b = jax.random.split(key, 3)

    B, C, H, W = 2, 4, 16, 16            # C*H*W = 1024, as the Linear requires
    num_class = 10

    x = jax.random.normal(k_x, (B, C, H, W), dtype=jnp.float32)

    # Deterministic parameter init (mimics nn.Linear's uniform(-1/sqrt(fan_in), ...)).
    bound = 1.0 / (1024.0 ** 0.5)
    weight = jax.random.uniform(k_w, (num_class, _K), jnp.float32, -bound, bound)
    bias = jax.random.uniform(k_b, (num_class,), jnp.float32, -bound, bound)

    # One-time weight prep (transpose + bf16 cast + lane padding).
    w_t_pad, b_pad, n_class = prepare_sqnet_fc_params(weight, bias)

    out = sqnet_fc_forward(x, w_t_pad, b_pad, n_class)
    jax.block_until_ready(out)

    # Reference with the same bf16 operand numerics (f32 accumulation).
    x_bf = x.reshape(B, -1).astype(jnp.bfloat16).astype(jnp.float32)
    w_bf = weight.astype(jnp.bfloat16).astype(jnp.float32)
    ref = x_bf @ w_bf.T + bias

    assert out.shape == (B, num_class)
    assert out.dtype == jnp.float32
    assert jnp.allclose(out, ref, atol=2e-3, rtol=2e-3)

    # Also exercise the multi-step grid with a ragged (masked) last block.
    B2 = 300
    x2 = jax.random.normal(jax.random.PRNGKey(1), (B2, C, H, W), dtype=jnp.float32)
    out2 = sqnet_fc_forward(x2, w_t_pad, b_pad, n_class)
    jax.block_until_ready(out2)
    x2_bf = x2.reshape(B2, -1).astype(jnp.bfloat16).astype(jnp.float32)
    ref2 = x2_bf @ w_bf.T + bias
    assert out2.shape == (B2, num_class)
    assert jnp.allclose(out2, ref2, atol=2e-3, rtol=2e-3)

    print("KERNEL_OK")
</pallas_src>

<mosaic_0001>
module attributes {stable_mosaic.version = 11 : i64} {
  func.func @_linear_kernel(%arg0: i32, %arg1: memref<2x1024xf32, #tpu.memory_space<vmem>>, %arg2: memref<1024x128xbf16, #tpu.memory_space<vmem>>, %arg3: memref<1x128xf32, #tpu.memory_space<vmem>>, %arg4: memref<2x128xf32, #tpu.memory_space<vmem>>) attributes {dimension_semantics = [#tpu.dimension_semantics<parallel>], iteration_bounds = array<i64: 1>, scalar_prefetch = 0 : i64, scratch_operands = 0 : i64, tpu.core_type = #tpu.core_type<tc>, window_params = [{transform_indices = @transform_0, window_bounds = array<i64: 2, 1024>}, {pipeline_mode = #tpu.pipeline_mode<synchronous>, transform_indices = @transform_1, window_bounds = array<i64: 1024, 128>}, {pipeline_mode = #tpu.pipeline_mode<synchronous>, transform_indices = @transform_2, window_bounds = array<i64: 1, 128>}, {transform_indices = @transform_3, window_bounds = array<i64: 2, 128>}]} {
    %c0 = arith.constant 0 : index
    %c0_0 = arith.constant 0 : index
    %0 = vector.load %arg1[%c0, %c0_0] : memref<2x1024xf32, #tpu.memory_space<vmem>>, vector<2x1024xf32>
    %1 = arith.truncf %0 : vector<2x1024xf32> to vector<2x1024xbf16>
    %c0_1 = arith.constant 0 : index
    %c0_2 = arith.constant 0 : index
    %2 = vector.load %arg2[%c0_1, %c0_2] : memref<1024x128xbf16, #tpu.memory_space<vmem>>, vector<1024x128xbf16>
    %cst = arith.constant dense<0.000000e+00> : vector<2x128xf32>
    %3 = tpu.matmul %1, %2, %cst {dimension_numbers = #tpu.dot_dimension_numbers<[1], [0], [0], [1], [0, 0, 1, 1], [], []>} : vector<2x1024xbf16>, vector<1024x128xbf16>, vector<2x128xf32> -> vector<2x128xf32>
    %c0_3 = arith.constant 0 : index
    %c0_4 = arith.constant 0 : index
    %4 = vector.load %arg3[%c0_3, %c0_4] : memref<1x128xf32, #tpu.memory_space<vmem>>, vector<1x128xf32>
    %5 = vector.broadcast %4 : vector<1x128xf32> to vector<2x128xf32>
    %6 = arith.addf %3, %5 : vector<2x128xf32>
    %c0_5 = arith.constant 0 : index
    %c0_6 = arith.constant 0 : index
    %7 = vector.load %arg4[%c0_5, %c0_6] : memref<2x128xf32, #tpu.memory_space<vmem>>, vector<2x128xf32>
    tpu.vector_store %arg4[%c0_5, %c0_6], %6 {strides = array<i32>} : memref<2x128xf32, #tpu.memory_space<vmem>>, vector<2x128xf32>,
    return
  }
  func.func @transform_0(%arg0: i32) -> (i32, i32) {
    %c0_i32 = arith.constant 0 : i32
    %c0_i32_0 = arith.constant 0 : i32
    return %arg0, %c0_i32 : i32, i32
  }
  func.func @transform_1(%arg0: i32) -> (i32, i32) {
    %c0_i32 = arith.constant 0 : i32
    %c0_i32_0 = arith.constant 0 : i32
    %c0_i32_1 = arith.constant 0 : i32
    return %c0_i32, %c0_i32_0 : i32, i32
  }
  func.func @transform_2(%arg0: i32) -> (i32, i32) {
    %c0_i32 = arith.constant 0 : i32
    %c0_i32_0 = arith.constant 0 : i32
    %c0_i32_1 = arith.constant 0 : i32
    return %c0_i32, %c0_i32_0 : i32, i32
  }
  func.func @transform_3(%arg0: i32) -> (i32, i32) {
    %c0_i32 = arith.constant 0 : i32
    %c0_i32_0 = arith.constant 0 : i32
    return %arg0, %c0_i32 : i32, i32
  }
}

</mosaic_0001>

<bundles_post_ra>
// kernel: tpu_custom_call.1
= control target key start
LH: loop header
LB: loop body
LE: loop exit
PB: predicated region body
PF: predicated region fallthrough
CT: control target
= control target key end

     0   :  { %8 = vsyncpa [#allocation3], 0  ;;  %s1127_s0 = inlined_call_operand.hbm [shape: f32[2,1024], index: 0, kind: input, shape index: {}]   ;;  %s1128_s1 = inlined_call_operand.hbm [shape: bf16[1024,128], index: 1, kind: input, shape index: {}]   ;;  %s1129_s2 = inlined_call_operand.vmem [shape: f32[1,128], index: 2, kind: input, shape index: {}]   ;;  %s1130_s3 = inlined_call_operand.hbm [shape: f32[2,128], index: 3, kind: output, shape index: {}]  }
   0x1   :  { %9 = vsyncpa [#allocation6], 0 }
   0x2   :  { %10 = vsyncpa [#allocation4], 0  ;;  %s1083_s12 = smov [#allocation2]   ;;  %s1084_s14 = smov [#allocation5]  }
   0x3   :  { %s17_s13 = sshll.u32 %s1083_s12, 4  ;;  %s26_s15 = sshll.u32 %s1084_s14, 4  ;;  %s18_s13 = int_to_ptr.vmem [resolvable:$true] %s17_s13  ;;  %s27_s15 = int_to_ptr.vmem [resolvable:$true] %s26_s15 }
   0x4   :  { %s1025_s16 = scalar_lea.vmem %s18_s13, 256  ;;  %p1030_p1 = scmp.lt.s32.totalorder %s18_s13, %s18_s13 }
   0x5   :  { %p1026_p0 = scmp.ne.s32.totalorder %s18_s13, %s1025_s16  ;;  %p1031_p2 = scmp.lt.s32.totalorder %s1025_s16, %s1025_s16 }
   0x7   :  { %p1032_p3 = por %p1031_p2, %p1030_p1 }
   0x9   :  { %p1033_p4 = pnand %p1032_p3, %p1026_p0 }
   0xb   :  { %1036 = shalt.err (!%p1033_p4)
}
   0xc   :  { %20 = dma.hbm_to_vmem [thread:$0]  %s1127_s0, 256, %s18_s13, [#allocation3]  }
   0xd   :  { %s1045_s19 = scalar_lea.vmem %s27_s15, 8192  ;;  %p1050_p6 = scmp.lt.s32.totalorder %s27_s15, %s27_s15 }
   0xe   :  { %p1046_p5 = scmp.ne.s32.totalorder %s27_s15, %s1045_s19  ;;  %p1051_p7 = scmp.lt.s32.totalorder %s1045_s19, %s1045_s19 }
  0x10   :  { %p1052_p8 = por %p1051_p7, %p1050_p6 }
  0x12   :  { %p1053_p9 = pnand %p1052_p8, %p1046_p5 }
  0x14   :  { %1056 = shalt.err (!%p1053_p9)
}
  0x15   :  { %s1085_s20 = smov 64   ;;  %s1086_s21 = smov 4  }
  0x16   :  { %32 = dma.hbm_to_vmem [thread:$0]  %s1128_s1, 8192, %s27_s15, [#allocation6], %s1085_s20, %s1085_s20, %s1086_s21  }
  0x17   :  { %1077 = dma.done.wait [#allocation3], 256  }
  0x18   :  { %1078 = vsyncadd [#allocation3], 4294967040 }
  0x19   :  { %1079 = dma.done.wait [#allocation6], 8192  }
  0x1a   :  { %1080 = vsyncadd [#allocation6], 4294959104  ;;  %v951_v0 = vld [vmem:[#allocation5 + $0x78] sm:$0xff]   ;;  %v955_v4 = vld [vmem:[#allocation5 + $0x70] sm:$0xff]   ;;  %v1087_v22 = vmov 1983009808   ;;  %v50_v24 = vlaneseq }
  0x1b   :  { %v952_v1 = vld [vmem:[#allocation5 + $0xf8] sm:$0xff]   ;;  %857 = vmatprep.subr.bf16.mxu0 %v951_v0  ;;  %v956_v5 = vld [vmem:[#allocation5 + $0xf0] sm:$0xff]   ;;  %v959_v8 = vld [vmem:[#allocation5 + $0x68] sm:$0xff]   ;;  %v48_v23 = vunpack.c.l.s4 %v1087_v22  ;;  %s1088_s24 = smov [#allocation7]  }
  0x1c   :  { %v953_v2 = vld [vmem:[#allocation5 + $0x38] sm:$0xff]   ;;  %879 = vmatprep.subr.bf16.mxu1 %v952_v1  ;;  %v957_v6 = vld [vmem:[#allocation5 + $0x30] sm:$0xff]   ;;  %v960_v9 = vld [vmem:[#allocation5 + $0xe8] sm:$0xff]   ;;  %v51_v30 = vshrl.u32 %v50_v24, 7  ;;  %s782_s25 = sshll.u32 %s1088_s24, 4  ;;  %s783_s25 = int_to_ptr.vmem [resolvable:$true] %s782_s25 }
  0x1d   :  { %v954_v3 = vld [vmem:[#allocation5 + $0xb8] sm:$0xff]   ;;  %858 = vmatpush3.bf16.msra.mxu0 %v953_v2  ;;  %v958_v7 = vld [vmem:[#allocation5 + $0xb0] sm:$0xff]   ;;  %v961_v10 = vld [vmem:[#allocation5 + $0x28] sm:$0xff]   ;;  %v49_v29 = vunpack.c.0.s8 %v48_v23  ;;  %p1062_p11 = scmp.lt.s32.totalorder %s783_s25, %s783_s25 }
  0x1e   :  { %880 = vmatpush3.bf16.msra.mxu1 %v954_v3  ;;  %859 = vmatprep.subr.bf16.mxu0 %v955_v4  ;;  %v962_v11 = vld [vmem:[#allocation5 + $0xa8] sm:$0xff]   ;;  %v963_v12 = vld [vmem:[#allocation5 + $0x60] sm:$0xff]   ;;  %v967_v16 = vld [vmem:[#allocation5 + $0x58] sm:$0xff]  }
  0x1f   :  { %881 = vmatprep.subr.bf16.mxu1 %v956_v5  ;;  %v964_v13 = vld [vmem:[#allocation5 + $0xe0] sm:$0xff]   ;;  %v968_v17 = vld [vmem:[#allocation5 + $0xd8] sm:$0xff]   ;;  %v971_v20 = vld [vmem:[#allocation5 + $0x50] sm:$0xff]   ;;  %v1115_v35 = vsub.s32 %v49_v29, %v51_v30 }
  0x20   :  { %v965_v14 = vld [vmem:[#allocation5 + $0x20] sm:$0xff]   ;;  %v969_v18 = vld [vmem:[#allocation5 + $0x18] sm:$0xff]   ;;  %v972_v21 = vld [vmem:[#allocation5 + $0xd0] sm:$0xff]  }
  0x21   :  { %860 = vmatpush3.bf16.msra.mxu0 %v957_v6  ;;  %v966_v15 = vld [vmem:[#allocation5 + $0xa0] sm:$0xff]   ;;  %v970_v19 = vld [vmem:[#allocation5 + $0x98] sm:$0xff]   ;;  %v973_v25 = vld [vmem:[#allocation5 + $0x10] sm:$0xff]  }
  0x22   :  { %882 = vmatpush3.bf16.msra.mxu1 %v958_v7  ;;  %861 = vmatprep.subr.bf16.mxu0 %v959_v8  ;;  %v974_v26 = vld [vmem:[#allocation5 + $0x90] sm:$0xff]   ;;  %v975_v27 = vld [vmem:[#allocation5 + $0x48] sm:$0xff]   ;;  %v979_v33 = vld [vmem:[#allocation5 + $0x40] sm:$0xff]  }
  0x23   :  { %883 = vmatprep.subr.bf16.mxu1 %v960_v9  ;;  %v976_v28 = vld [vmem:[#allocation5 + $0xc8] sm:$0xff]   ;;  %v980_v34 = vld [vmem:[#allocation5 + $0xc0] sm:$0xff]   ;;  %v42_v38 = vld [vmem:[#allocation2] sm:$0xff] }
  0x24   :  { %v977_v31 = vld [vmem:[#allocation5 + $0x8] sm:$0xff]   ;;  %v981_v36 = vld [vmem:[#allocation5] sm:$0xff]   ;;  %v53_v39 = vrot.slane %v42_v38, %v1115_v35  ;;  %v46_v40 = vcombine.high %v42_v38, %v42_v38  ;;  %v984_v41 = vld [vmem:[#allocation5 + $0x178] sm:$0xff]  }
  0x25   :  { %862 = vmatpush3.bf16.msra.mxu0 %v961_v10  ;;  %v978_v32 = vld [vmem:[#allocation5 + $0x88] sm:$0xff]   ;;  %v982_v37 = vld [vmem:[#allocation5 + $0x80] sm:$0xff]   ;;  %v985_v42 = vld [vmem:[#allocation5 + $0x1f8] sm:$0xff]  }
  0x26   :  { %884 = vmatpush3.bf16.msra.mxu1 %v962_v11  ;;  %863 = vmatprep.subr.bf16.mxu0 %v963_v12  ;;  %v61_v43 = vcombine.high %v53_v39, %v53_v39  ;;  %v60_v44 = vrot.slane %v46_v40, %v1115_v35  ;;  %v88_v45 = vpack.c.bf16 %v53_v39, %v53_v39  ;;  %v986_v48 = vld [vmem:[#allocation5 + $0x138] sm:$0xff]   ;;  %v988_v50 = vld [vmem:[#allocation5 + $0x170] sm:$0xff]   ;;  %v992_v55 = vld [vmem:[#allocation5 + $0x168] sm:$0xff]  }
  0x27   :  { %885 = vmatprep.subr.bf16.mxu1 %v964_v13  ;;  %v987_v52 = vld [vmem:[#allocation5 + $0x1b8] sm:$0xff]   ;;  %v989_v53 = vld [vmem:[#allocation5 + $0x1f0] sm:$0xff]   ;;  %v993_v57 = vld [vmem:[#allocation5 + $0x1e8] sm:$0xff]  }
  0x28   :  { %v89_v46 = vpack.c.bf16 %v61_v43, %v61_v43  ;;  %v62_v47 = vcombine.high %v60_v44, %v60_v44  ;;  %v90_v49 = vpack.c.bf16 %v60_v44, %v60_v44  ;;  %v990_v54 = vld [vmem:[#allocation5 + $0x130] sm:$0xff]   ;;  %v994_v58 = vld [vmem:[#allocation5 + $0x128] sm:$0xff]   ;;  %v996_v59 = vld [vmem:[#allocation5 + $0x160] sm:$0xff]  }
  0x29   :  { %864 = vmatpush3.bf16.msra.mxu0 %v965_v14  ;;  %v991_v56 = vld [vmem:[#allocation5 + $0x1b0] sm:$0xff]   ;;  %v995_v60 = vld [vmem:[#allocation5 + $0x1a8] sm:$0xff]   ;;  %v997_v61 = vld [vmem:[#allocation5 + $0x1e0] sm:$0xff]  }
  0x2a   :  { %886 = vmatpush3.bf16.msra.mxu1 %v966_v15  ;;  %865 = vmatprep.subr.bf16.mxu0 %v967_v16  ;;  %v91_v51 = vpack.c.bf16 %v62_v47, %v62_v47  ;;  %v998_v62 = vld [vmem:[#allocation5 + $0x120] sm:$0xff]   ;;  %v1000_v63 = vld [vmem:[#allocation5 + $0x158] sm:$0xff]   ;;  %v1004_v3 = vld [vmem:[#allocation5 + $0x150] sm:$0xff]  }
  0x2b   :  { %887 = vmatprep.subr.bf16.mxu1 %v968_v17  ;;  %647 = vmatprep.mubr.bf16.mxu0 %v89_v46  ;;  %v999_v0 = vld [vmem:[#allocation5 + $0x1a0] sm:$0xff]   ;;  %v1001_v1 = vld [vmem:[#allocation5 + $0x1d8] sm:$0xff]   ;;  %v1005_v5 = vld [vmem:[#allocation5 + $0x1d0] sm:$0xff]  }
  0x2c   :  { %687 = vmatprep.mubr.bf16.mxu1 %v91_v51  ;;  %v1002_v2 = vld [vmem:[#allocation5 + $0x118] sm:$0xff]   ;;  %v1006_v6 = vld [vmem:[#allocation5 + $0x110] sm:$0xff]   ;;  %v1008_v7 = vld [vmem:[#allocation5 + $0x148] sm:$0xff]  }
  0x2d   :  { %866 = vmatpush3.bf16.msra.mxu0 %v969_v18  ;;  %v1003_v4 = vld [vmem:[#allocation5 + $0x198] sm:$0xff]   ;;  %v1007_v8 = vld [vmem:[#allocation5 + $0x190] sm:$0xff]   ;;  %v1009_v9 = vld [vmem:[#allocation5 + $0x1c8] sm:$0xff]  }
  0x2e   :  { %888 = vmatpush3.bf16.msra.mxu1 %v970_v19  ;;  %867 = vmatprep.subr.bf16.mxu0 %v971_v20  ;;  %v1010_v10 = vld [vmem:[#allocation5 + $0x108] sm:$0xff]   ;;  %v1012_v11 = vld [vmem:[#allocation5 + $0x140] sm:$0xff]   ;;  %v43_v14 = vld [vmem:[#allocation2 + $0x8] sm:$0xff] }
  0x2f   :  { %889 = vmatprep.subr.bf16.mxu1 %v972_v21  ;;  %v1011_v12 = vld [vmem:[#allocation5 + $0x188] sm:$0xff]   ;;  %v1013_v13 = vld [vmem:[#allocation5 + $0x1c0] sm:$0xff]   ;;  %v70_v16 = vrot.slane %v43_v14, %v1115_v35  ;;  %v63_v17 = vcombine.high %v43_v14, %v43_v14 }
  0x30   :  { %v1014_v15 = vld [vmem:[#allocation5 + $0x100] sm:$0xff]  }
  0x31   :  { %868 = vmatpush3.bf16.msra.mxu0 %v973_v25  ;;  %v1015_v18 = vld [vmem:[#allocation5 + $0x180] sm:$0xff]   ;;  %v78_v19 = vcombine.high %v70_v16, %v70_v16  ;;  %v77_v20 = vrot.slane %v63_v17, %v1115_v35  ;;  %v92_v21 = vpack.c.bf16 %v70_v16, %v70_v16  ;;  %v792_v35 = vld [vmem:[%s1129_s2] ss:$0 sm:$0xff]  ;;  %s1057_s2 = scalar_lea.vmem %s783_s25, 32 }
  0x32   :  { %890 = vmatpush3.bf16.msra.mxu1 %v974_v26  ;;  %869 = vmatprep.subr.bf16.mxu0 %v975_v27  ;;  %p1058_p10 = scmp.ne.s32.totalorder %s783_s25, %s1057_s2  ;;  %p1063_p12 = scmp.lt.s32.totalorder %s1057_s2, %s1057_s2 }
  0x33   :  { %891 = vmatprep.subr.bf16.mxu1 %v976_v28  ;;  %v93_v22 = vpack.c.bf16 %v78_v19, %v78_v19  ;;  %v79_v23 = vcombine.high %v77_v20, %v77_v20  ;;  %v94_v24 = vpack.c.bf16 %v77_v20, %v77_v20 }
  0x34   :  { %p1064_p13 = por %p1063_p12, %p1062_p11 }
  0x35   :  { %870 = vmatpush3.bf16.msra.mxu0 %v977_v31  ;;  %v95_v25 = vpack.c.bf16 %v79_v23, %v79_v23 }
  0x36   :  { %892 = vmatpush3.bf16.msra.mxu1 %v978_v32  ;;  %871 = vmatprep.subr.bf16.mxu0 %v979_v33  ;;  %p1065_p0 = pnand %p1064_p13, %p1058_p10 }
  0x37   :  { %893 = vmatprep.subr.bf16.mxu1 %v980_v34 }
  0x39   :  { %872 = vmatpush3.bf16.msra.mxu0 %v981_v36 }
  0x3a   :  { %894 = vmatpush3.bf16.msra.mxu1 %v982_v37  ;;  %901 = vmatprep.subr.bf16.mxu0 %v984_v41 }
  0x3b   :  { %923 = vmatprep.subr.bf16.mxu1 %v985_v42 }
  0x3c   :  { %648 = vmatmul.mubr.bf16.vlgmr.msra.gmra.mxu0 %v88_v45 }
  0x3d   :  { %902 = vmatpush3.bf16.msra.mxu0 %v986_v48  ;;  %688 = vmatmul.mubr.bf16.vlgmr.msra.gmra.mxu1 %v90_v49 }
  0x3e   :  { %903 = vmatprep.subr.bf16.mxu0 %v988_v50  ;;  %924 = vmatpush3.bf16.msra.mxu1 %v987_v52 }
  0x3f   :  { %925 = vmatprep.subr.bf16.mxu1 %v989_v53  ;;  %727 = vmatprep.mubr.bf16.mxu0 %v93_v22 }
  0x40   :  { %767 = vmatprep.mubr.bf16.mxu1 %v95_v25 }
  0x41   :  { %904 = vmatpush3.bf16.msra.mxu0 %v990_v54 }
  0x42   :  { %905 = vmatprep.subr.bf16.mxu0 %v992_v55  ;;  %926 = vmatpush3.bf16.msra.mxu1 %v991_v56 }
  0x43   :  { %927 = vmatprep.subr.bf16.mxu1 %v993_v57 }
  0x45   :  { %906 = vmatpush3.bf16.msra.mxu0 %v994_v58 }
  0x46   :  { %907 = vmatprep.subr.bf16.mxu0 %v996_v59  ;;  %928 = vmatpush3.bf16.msra.mxu1 %v995_v60 }
  0x47   :  { %929 = vmatprep.subr.bf16.mxu1 %v997_v61 }
  0x49   :  { %908 = vmatpush3.bf16.msra.mxu0 %v998_v62 }
  0x4a   :  { %909 = vmatprep.subr.bf16.mxu0 %v1000_v63  ;;  %930 = vmatpush3.bf16.msra.mxu1 %v999_v0 }
  0x4b   :  { %931 = vmatprep.subr.bf16.mxu1 %v1001_v1 }
  0x4d   :  { %910 = vmatpush3.bf16.msra.mxu0 %v1002_v2 }
  0x4e   :  { %911 = vmatprep.subr.bf16.mxu0 %v1004_v3  ;;  %932 = vmatpush3.bf16.msra.mxu1 %v1003_v4 }
  0x4f   :  { %933 = vmatprep.subr.bf16.mxu1 %v1005_v5 }
  0x51   :  { %912 = vmatpush3.bf16.msra.mxu0 %v1006_v6 }
  0x52   :  { %913 = vmatprep.subr.bf16.mxu0 %v1008_v7  ;;  %934 = vmatpush3.bf16.msra.mxu1 %v1007_v8 }
  0x53   :  { %935 = vmatprep.subr.bf16.mxu1 %v1009_v9 }
  0x55   :  { %914 = vmatpush3.bf16.msra.mxu0 %v1010_v10 }
  0x56   :  { %915 = vmatprep.subr.bf16.mxu0 %v1012_v11  ;;  %936 = vmatpush3.bf16.msra.mxu1 %v1011_v12 }
  0x57   :  { %937 = vmatprep.subr.bf16.mxu1 %v1013_v13 }
  0x59   :  { %916 = vmatpush3.bf16.msra.mxu0 %v1014_v15 }
  0x5a   :  { %938 = vmatpush3.bf16.msra.mxu1 %v1015_v18 }
  0x5c   :  { %728 = vmatmul.mubr.bf16.vlgmr.msra.gmra.mxu0 %v92_v21 }
  0x5d   :  { %768 = vmatmul.mubr.bf16.vlgmr.msra.gmra.mxu1 %v94_v24 }
  0xfc   :  { %v873_v26 = vpop.f32.mrf.mxu0 }
  0xfd   :  { %v895_v27 = vpop.f32.mrf.mxu1 }
  0xfe   :  { %v874_v28 = vpop.f32.mrf.mxu0 }
  0xff   :  { %v896_v29 = vpop.f32.mrf.mxu1  ;;  %v875_v34 = vadd.f32 %v874_v28, %v873_v26 }
 0x100   :  { %v876_v30 = vpop.f32.mrf.mxu0  ;;  %v897_v37 = vadd.f32 %v896_v29, %v895_v27 }
 0x101   :  { %v898_v31 = vpop.f32.mrf.mxu1  ;;  %v650_v36 = vadd.f32 %v875_v34, %v792_v35 }
 0x102   :  { %v877_v32 = vpop.f32.mrf.mxu0 }
 0x103   :  { %v899_v33 = vpop.f32.mrf.mxu1  ;;  %v690_v41 = vadd.f32 %v897_v37, %v650_v36 }
 0x11c   :  { %v917_v38 = vpop.f32.mrf.mxu0 }
 0x11d   :  { %v939_v39 = vpop.f32.mrf.mxu1 }
 0x11e   :  { %v918_v40 = vpop.f32.mrf.mxu0 }
 0x11f   :  { %v919_v42 = vadd.f32 %v918_v40, %v917_v38  ;;  %v940_v43 = vpop.f32.mrf.mxu1 }
 0x120   :  { %v920_v44 = vpop.f32.mrf.mxu0  ;;  %v941_v46 = vadd.f32 %v940_v43, %v939_v39 }
 0x121   :  { %v730_v45 = vadd.f32 %v919_v42, %v690_v41  ;;  %v942_v47 = vpop.f32.mrf.mxu1 }
 0x122   :  { %v921_v48 = vpop.f32.mrf.mxu0 }
 0x123   :  { %v770_v49 = vadd.f32 %v941_v46, %v730_v45  ;;  %v943_v50 = vpop.f32.mrf.mxu1 }
 0x125   :  { %775 = vst [vmem:[#allocation7] sm:$0x3] %v770_v49 }
 0x126   :  { %1068 = shalt.err (!%p1065_p0)
}
 0x127   :  { %785 = dma.vmem_to_hbm [thread:$0]  %s783_s25, 32, %s1130_s3, [#allocation4]  }
 0x128   :  { %1081 = dma.done.wait [#allocation4], 32  }
 0x129   :  { %1082 = vsyncadd [#allocation4], 4294967264 }
 0x12a   :  { %789 = vsyncpa [#allocation3], 1 }
 0x12b   :  { %790 = vsyncpa [#allocation6], 1 }
 0x12c   :  { %791 = vsyncpa [#allocation4], 1 }

</bundles_post_ra>
